<compile_context>
chip_gen: v7x
topology: tpu7x:2x2x1
jax: 0.10.0
libtpu: 0.0.40
codegen_flags: <defaults>
</compile_context>

<pallas_src>
import functools

import jax
import jax.numpy as jnp
from jax import lax
from jax.experimental import pallas as pl
from jax.experimental.pallas import tpu as pltpu


# ---------------------------------------------------------------------------
# Fused path: pool + excite + scale in one kernel, TB samples per grid step.
# ---------------------------------------------------------------------------
def _se_fused_kernel(x_ref, w1_ref, w2_ref, o_ref, *, inv_hw):
    x = x_ref[...]                                              # (TB, C, HW), native dtype
    # Squeeze: f32 accumulation without materializing an f32 copy of the tile.
    pooled = jnp.sum(x, axis=-1, dtype=jnp.float32) * inv_hw    # (TB, C) f32
    # Excite (batched over TB samples).
    w1 = w1_ref[...].astype(jnp.float32)                        # (Cr, C)
    w2 = w2_ref[...].astype(jnp.float32)                        # (C, Cr)
    h = lax.dot_general(pooled, w1, (((1,), (1,)), ((), ())),
                        preferred_element_type=jnp.float32)     # (TB, Cr)
    h = jnp.maximum(h, 0.0)
    s = lax.dot_general(h, w2, (((1,), (1,)), ((), ())),
                        preferred_element_type=jnp.float32)     # (TB, C)
    s = jax.nn.sigmoid(s)
    # Scale: broadcast per-channel gate over spatial lanes, native-dtype math.
    o_ref[...] = (x * s[:, :, None].astype(x.dtype)).astype(o_ref.dtype)


# ---------------------------------------------------------------------------
# Two-phase path (used when a full sample does not fit the VMEM block budget).
# ---------------------------------------------------------------------------
def _se_pool_excite_kernel(x_ref, w1_ref, w2_ref, gate_ref, acc_ref, *, inv_hw):
    t = pl.program_id(1)

    @pl.when(t == 0)
    def _init():
        acc_ref[...] = jnp.zeros_like(acc_ref)

    # Partial spatial sum for this HW tile, f32 accumulation.
    acc_ref[...] += jnp.sum(x_ref[...], axis=-1, dtype=jnp.float32)   # (1, C)

    @pl.when(t == pl.num_programs(1) - 1)
    def _finalize():
        pooled = acc_ref[...] * inv_hw                          # (1, C) f32
        w1 = w1_ref[...].astype(jnp.float32)                    # (Cr, C)
        w2 = w2_ref[...].astype(jnp.float32)                    # (C, Cr)
        h = lax.dot_general(pooled, w1, (((1,), (1,)), ((), ())),
                            preferred_element_type=jnp.float32) # (1, Cr)
        h = jnp.maximum(h, 0.0)
        s = lax.dot_general(h, w2, (((1,), (1,)), ((), ())),
                            preferred_element_type=jnp.float32) # (1, C)
        gate_ref[...] = jax.nn.sigmoid(s)[:, :, None]           # (1, C, 1)


def _se_scale_kernel(x_ref, gate_ref, o_ref):
    x = x_ref[...]                                              # (1, C, thw)
    s = gate_ref[...].astype(x.dtype)                           # (1, C, 1)
    o_ref[...] = (x * s).astype(o_ref.dtype)


# ---------------------------------------------------------------------------
# Helpers.
# ---------------------------------------------------------------------------
def _largest_divisor_at_most(n, cap):
    cap = max(1, min(n, cap))
    for d in range(cap, 0, -1):
        if n % d == 0:
            return d
    return 1


def _pick_hw_tile(hw, max_elems):
    """Largest divisor of hw that is a multiple of 128 and <= max_elems (or None)."""
    best = None
    for thw in range(128, hw + 1, 128):
        if hw % thw == 0 and thw <= max_elems:
            best = thw
    return best


def se_module(x, w1, w2, *, max_block_bytes=3 << 20):
    """SE forward.  x: (N, C, H, W); w1: (C//r, C); w2: (C, C//r) (PyTorch Linear layout)."""
    N, C, H, W = x.shape
    HW = H * W
    Cr = w1.shape[0]
    itemsize = jnp.dtype(x.dtype).itemsize
    w_bytes = (w1.size * jnp.dtype(w1.dtype).itemsize
               + w2.size * jnp.dtype(w2.dtype).itemsize)
    x_flat = x.reshape(N, C, HW)
    per_sample_bytes = C * HW * itemsize
    inv_hw = float(1.0 / HW)

    def _vmem_limit(block_bytes, num_block_buffers):
        # streamed block buffers + weights + headroom; clamp to a value that is
        # valid on v5e/v6e (128 MiB VMEM) and v7x (64 MiB VMEM).
        need = num_block_buffers * block_bytes + 2 * w_bytes + (4 << 20)
        return int(min(max(need, 16 << 20), 48 << 20))

    hw_tile = _pick_hw_tile(HW, max_elems=max(1, max_block_bytes // (C * itemsize)))

    # ------------------------------ fused path ------------------------------
    if per_sample_bytes <= max_block_bytes or hw_tile is None:
        # TODO(synk): if per_sample_bytes > budget AND no 128-multiple HW split
        # exists, we fall back to one whole sample per step (original behavior).
        tb = _largest_divisor_at_most(N, max(1, max_block_bytes // per_sample_bytes))
        block_bytes = tb * per_sample_bytes
        cost = pl.CostEstimate(
            flops=2 * N * C * HW + 4 * N * C * Cr,
            transcendentals=N * C,
            bytes_accessed=2 * N * C * HW * itemsize + w_bytes,
        )
        out_flat = pl.pallas_call(
            functools.partial(_se_fused_kernel, inv_hw=inv_hw),
            out_shape=jax.ShapeDtypeStruct((N, C, HW), x.dtype),
            grid_spec=pltpu.PrefetchScalarGridSpec(
                num_scalar_prefetch=0,
                grid=(N // tb,),
                in_specs=[
                    pl.BlockSpec((tb, C, HW), lambda n: (n, 0, 0)),
                    pl.BlockSpec(w1.shape, lambda n: (0, 0)),
                    pl.BlockSpec(w2.shape, lambda n: (0, 0)),
                ],
                out_specs=pl.BlockSpec((tb, C, HW), lambda n: (n, 0, 0)),
            ),
            compiler_params=pltpu.CompilerParams(
                dimension_semantics=("parallel",),
                vmem_limit_bytes=_vmem_limit(block_bytes, num_block_buffers=4),
            ),
            cost_estimate=cost,
        )(x_flat, w1, w2)
        return out_flat.reshape(N, C, H, W)

    # ----------------------------- two-phase path ----------------------------
    n_hw_tiles = HW // hw_tile
    tile_bytes = C * hw_tile * itemsize

    # Phase 1: pool + excite -> per-sample channel gate, shape (N, C, 1) f32.
    gate_cost = pl.CostEstimate(
        flops=N * C * HW + 4 * N * C * Cr,
        transcendentals=N * C,
        bytes_accessed=N * C * HW * itemsize + w_bytes + N * C * 4,
    )
    gate = pl.pallas_call(
        functools.partial(_se_pool_excite_kernel, inv_hw=inv_hw),
        out_shape=jax.ShapeDtypeStruct((N, C, 1), jnp.float32),
        grid_spec=pltpu.PrefetchScalarGridSpec(
            num_scalar_prefetch=0,
            grid=(N, n_hw_tiles),
            in_specs=[
                pl.BlockSpec((1, C, hw_tile), lambda n, t: (n, 0, t)),
                pl.BlockSpec(w1.shape, lambda n, t: (0, 0)),
                pl.BlockSpec(w2.shape, lambda n, t: (0, 0)),
            ],
            out_specs=pl.BlockSpec((1, C, 1), lambda n, t: (n, 0, 0)),
            scratch_shapes=[pltpu.VMEM((1, C), jnp.float32)],
        ),
        compiler_params=pltpu.CompilerParams(
            dimension_semantics=("parallel", "arbitrary"),
            vmem_limit_bytes=_vmem_limit(tile_bytes, num_block_buffers=3),
        ),
        cost_estimate=gate_cost,
    )(x_flat, w1, w2)

    # Phase 2: scale-only, fully parallel grid streaming x once more.
    if n_hw_tiles >= 4:
        x_spec = pl.BlockSpec((1, C, hw_tile), lambda n, t: (n, 0, t),
                              pipeline_mode=pl.Buffered(3))
        n_x_bufs = 3
    else:
        x_spec = pl.BlockSpec((1, C, hw_tile), lambda n, t: (n, 0, t))
        n_x_bufs = 2
    scale_cost = pl.CostEstimate(
        flops=N * C * HW,
        transcendentals=0,
        bytes_accessed=2 * N * C * HW * itemsize + N * C * 4,
    )
    out_flat = pl.pallas_call(
        _se_scale_kernel,
        out_shape=jax.ShapeDtypeStruct((N, C, HW), x.dtype),
        grid_spec=pltpu.PrefetchScalarGridSpec(
            num_scalar_prefetch=0,
            grid=(N, n_hw_tiles),
            in_specs=[
                x_spec,
                pl.BlockSpec((1, C, 1), lambda n, t: (n, 0, 0)),
            ],
            out_specs=pl.BlockSpec((1, C, hw_tile), lambda n, t: (n, 0, t)),
        ),
        compiler_params=pltpu.CompilerParams(
            dimension_semantics=("parallel", "parallel"),
            vmem_limit_bytes=_vmem_limit(tile_bytes, num_block_buffers=n_x_bufs + 3),
        ),
        cost_estimate=scale_cost,
    )(x_flat, gate)
    return out_flat.reshape(N, C, H, W)


def se_reference(x, w1, w2):
    """Plain JAX reference mirroring the PyTorch module."""
    y = jnp.mean(x, axis=(2, 3))                      # (N, C)
    y = jnp.maximum(y @ w1.T, 0.0)                    # (N, C//r)
    y = jax.nn.sigmoid(y @ w2.T)                      # (N, C)
    return x * y[:, :, None, None]


if __name__ == "__main__":
    key = jax.random.PRNGKey(0)
    reduction = 4

    # Case 1 (module's nominal small shape): exercises the fused, batch-tiled path.
    N, C, H, W = 2, 4, 16, 16
    Cr = max(1, C // reduction)
    kx, k1, k2 = jax.random.split(key, 3)
    x = jax.random.normal(kx, (N, C, H, W), dtype=jnp.float32)
    w1 = jax.random.normal(k1, (Cr, C), dtype=jnp.float32) * 0.5   # (out, in) layout
    w2 = jax.random.normal(k2, (C, Cr), dtype=jnp.float32) * 0.5

    out = jax.block_until_ready(se_module(x, w1, w2))
    ref = se_reference(x, w1, w2)
    assert out.shape == (N, C, H, W)
    assert jnp.allclose(out, ref, atol=1e-5, rtol=1e-5), "fused path mismatch vs reference"

    # Case 2: force the two-phase (pool+excite, then tiled scale) fallback by
    # shrinking the block budget — validates the large-feature-map / v7x path
    # (4 HW tiles of 128 lanes, Buffered(3) input pipelining on the scale kernel).
    N2, C2, H2, W2 = 2, 8, 16, 32          # HW = 512
    Cr2 = C2 // reduction
    kx2, k12, k22 = jax.random.split(jax.random.PRNGKey(1), 3)
    x2 = jax.random.normal(kx2, (N2, C2, H2, W2), dtype=jnp.float32)
    w12 = jax.random.normal(k12, (Cr2, C2), dtype=jnp.float32) * 0.5
    w22 = jax.random.normal(k22, (C2, Cr2), dtype=jnp.float32) * 0.5

    out2 = jax.block_until_ready(se_module(x2, w12, w22, max_block_bytes=4 * 1024))
    ref2 = se_reference(x2, w12, w22)
    assert out2.shape == (N2, C2, H2, W2)
    assert jnp.allclose(out2, ref2, atol=1e-5, rtol=1e-5), "two-phase path mismatch vs reference"

    print("KERNEL_OK")
</pallas_src>

<mosaic_0001>
module attributes {stable_mosaic.version = 11 : i64} {
  func.func @_se_fused_kernel(%arg0: i32, %arg1: memref<2x4x256xf32, #tpu.memory_space<vmem>>, %arg2: memref<1x4xf32, #tpu.memory_space<vmem>>, %arg3: memref<4x1xf32, #tpu.memory_space<vmem>>, %arg4: memref<2x4x256xf32, #tpu.memory_space<vmem>>) attributes {dimension_semantics = [#tpu.dimension_semantics<parallel>], iteration_bounds = array<i64: 1>, scalar_prefetch = 0 : i64, scratch_operands = 0 : i64, tpu.core_type = #tpu.core_type<tc>, window_params = [{transform_indices = @transform_0, window_bounds = array<i64: 2, 4, 256>}, {pipeline_mode = #tpu.pipeline_mode<synchronous>, transform_indices = @transform_1, window_bounds = array<i64: 1, 4>}, {pipeline_mode = #tpu.pipeline_mode<synchronous>, transform_indices = @transform_2, window_bounds = array<i64: 4, 1>}, {transform_indices = @transform_3, window_bounds = array<i64: 2, 4, 256>}]} {
    %c0 = arith.constant 0 : index
    %c0_0 = arith.constant 0 : index
    %c0_1 = arith.constant 0 : index
    %0 = vector.load %arg1[%c0, %c0_0, %c0_1] : memref<2x4x256xf32, #tpu.memory_space<vmem>>, vector<2x4x256xf32>
    %cst = arith.constant dense<0.000000e+00> : vector<2x4xf32>
    %1 = vector.multi_reduction <add>, %0, %cst [2] : vector<2x4x256xf32> to vector<2x4xf32>
    %cst_2 = arith.constant 3.906250e-03 : f32
    %2 = vector.broadcast %cst_2 : f32 to vector<2x4xf32>
    %3 = arith.mulf %1, %2 : vector<2x4xf32>
    %c0_3 = arith.constant 0 : index
    %c0_4 = arith.constant 0 : index
    %4 = vector.load %arg2[%c0_3, %c0_4] : memref<1x4xf32, #tpu.memory_space<vmem>>, vector<1x4xf32>
    %c0_5 = arith.constant 0 : index
    %c0_6 = arith.constant 0 : index
    %5 = vector.load %arg3[%c0_5, %c0_6] : memref<4x1xf32, #tpu.memory_space<vmem>>, vector<4x1xf32>
    %cst_7 = arith.constant dense<0.000000e+00> : vector<2x1xf32>
    %6 = tpu.matmul %3, %4, %cst_7 {dimension_numbers = #tpu.dot_dimension_numbers<[1], [1], [0], [0], [0, 0, 1, 0], [], []>} : vector<2x4xf32>, vector<1x4xf32>, vector<2x1xf32> -> vector<2x1xf32>
    %cst_8 = arith.constant 0.000000e+00 : f32
    %7 = vector.broadcast %cst_8 : f32 to vector<2x1xf32>
    %8 = arith.maximumf %6, %7 : vector<2x1xf32>
    %cst_9 = arith.constant dense<0.000000e+00> : vector<2x4xf32>
    %9 = tpu.matmul %8, %5, %cst_9 {dimension_numbers = #tpu.dot_dimension_numbers<[1], [1], [0], [0], [0, 0, 1, 0], [], []>} : vector<2x1xf32>, vector<4x1xf32>, vector<2x4xf32> -> vector<2x4xf32>
    %10 = arith.negf %9 : vector<2x4xf32>
    %11 = math.exp %10 : vector<2x4xf32>
    %cst_10 = arith.constant 1.000000e+00 : f32
    %12 = vector.broadcast %cst_10 : f32 to vector<2x4xf32>
    %13 = arith.addf %12, %11 : vector<2x4xf32>
    %14 = arith.divf %12, %13 : vector<2x4xf32>
    %15 = vector.shape_cast %14 : vector<2x4xf32> to vector<2x4x1xf32>
    %16 = vector.broadcast %15 : vector<2x4x1xf32> to vector<2x4x256xf32>
    %17 = arith.mulf %0, %16 : vector<2x4x256xf32>
    %c0_11 = arith.constant 0 : index
    %c0_12 = arith.constant 0 : index
    %c0_13 = arith.constant 0 : index
    %18 = vector.load %arg4[%c0_11, %c0_12, %c0_13] : memref<2x4x256xf32, #tpu.memory_space<vmem>>, vector<2x4x256xf32>
    tpu.vector_store %arg4[%c0_11, %c0_12, %c0_13], %17 {strides = array<i32>} : memref<2x4x256xf32, #tpu.memory_space<vmem>>, vector<2x4x256xf32>,
    return
  }
  func.func @transform_0(%arg0: i32) -> (i32, i32, i32) {
    %c0_i32 = arith.constant 0 : i32
    %c0_i32_0 = arith.constant 0 : i32
    %c0_i32_1 = arith.constant 0 : i32
    return %arg0, %c0_i32, %c0_i32_0 : i32, i32, i32
  }
  func.func @transform_1(%arg0: i32) -> (i32, i32) {
    %c0_i32 = arith.constant 0 : i32
    %c0_i32_0 = arith.constant 0 : i32
    %c0_i32_1 = arith.constant 0 : i32
    return %c0_i32, %c0_i32_0 : i32, i32
  }
  func.func @transform_2(%arg0: i32) -> (i32, i32) {
    %c0_i32 = arith.constant 0 : i32
    %c0_i32_0 = arith.constant 0 : i32
    %c0_i32_1 = arith.constant 0 : i32
    return %c0_i32, %c0_i32_0 : i32, i32
  }
  func.func @transform_3(%arg0: i32) -> (i32, i32, i32) {
    %c0_i32 = arith.constant 0 : i32
    %c0_i32_0 = arith.constant 0 : i32
    %c0_i32_1 = arith.constant 0 : i32
    return %arg0, %c0_i32, %c0_i32_0 : i32, i32, i32
  }
}

</mosaic_0001>

<bundles_post_ra>
// kernel: tpu_custom_call.1
= control target key start
LH: loop header
LB: loop body
LE: loop exit
PB: predicated region body
PF: predicated region fallthrough
CT: control target
= control target key end

     0   :  { %8 = vsyncpa [#allocation3], 0  ;;  %s378_s0 = inlined_call_operand.hbm [shape: f32[2,4,256], index: 0, kind: input, shape index: {}]   ;;  %s379_s1 = inlined_call_operand.vmem [shape: f32[1,4], index: 1, kind: input, shape index: {}]   ;;  %s380_s2 = inlined_call_operand.vmem [shape: f32[4,1], index: 2, kind: input, shape index: {}]   ;;  %s381_s3 = inlined_call_operand.hbm [shape: f32[2,4,256], index: 3, kind: output, shape index: {}]  }
   0x1   :  { %9 = vsyncpa [#allocation4], 0  ;;  %s300_s12 = smov [#allocation2]   ;;  %s252_s16 = scalar_lea.hbm %s378_s0, 256 }
   0x2   :  { %s15_s13 = sshll.u32 %s300_s12, 4  ;;  %p253_p0 = scmp.ne.s32.totalorder %s378_s0, %s252_s16  ;;  %s16_s13 = int_to_ptr.vmem [resolvable:$true] %s15_s13 }
   0x3   :  { %p256_p1 = scmp.lt.u32.totalorder %s252_s16, %s378_s0 }
   0x5   :  { %p258_p2 = pnand %p256_p1, %p253_p0 }
   0x7   :  { %261 = shalt.err (!%p258_p2)
}
   0x8   :  { %s262_s21 = scalar_lea.vmem %s16_s13, 256  ;;  %p267_p4 = scmp.lt.s32.totalorder %s16_s13, %s16_s13 }
   0x9   :  { %p263_p3 = scmp.ne.s32.totalorder %s16_s13, %s262_s21  ;;  %p268_p5 = scmp.lt.s32.totalorder %s262_s21, %s262_s21 }
   0xb   :  { %p269_p6 = por %p268_p5, %p267_p4 }
   0xd   :  { %p270_p7 = pnand %p269_p6, %p263_p3 }
   0xf   :  { %273 = shalt.err (!%p270_p7)
}
  0x10   :  { %s301_s22 = smov 128   ;;  %s302_s23 = smov 8  }
  0x11   :  { %21 = dma.hbm_to_vmem [thread:$0]  %s378_s0, 256, %s16_s13, [#allocation3], %s301_s22, %s301_s22, %s302_s23  }
  0x12   :  { %296 = dma.done.wait [#allocation3], 256  }
  0x13   :  { %297 = vsyncadd [#allocation3], 4294967040  ;;  %vm37_vm0 = vcmask 1043456   ;;  %v343_v0 = vld [vmem:[#allocation2] sm:$0xff]  ;;  %v345_v1 = vld [vmem:[#allocation2 + $0x8] sm:$0xff]  ;;  %v303_v11 = vmov 0   ;;  %v71_v21 = vlaneseq }
  0x14   :  { %v225_v2 = vld [vmem:[%s379_s1] ss:$0 sm:$0xff]  ;;  %v33_v3 = vcombine.high %v343_v0, %v343_v0  ;;  %v38_v4 = vsel %vm37_vm0, %v343_v0, 0.0  ;;  %v34_v5 = vcombine.high %v345_v1, %v345_v1  ;;  %v43_v7 = vsel %vm37_vm0, %v345_v1, 0.0  ;;  %244 = vset.pattern.permute.xlu1 %v303_v11  ;;  %245 = vset.pattern.permute.xlu0 %v303_v11 }
  0x15   :  { %58 = vbcast.lane.b32.xlu1 %v225_v2, 256  ;;  %v51_v19 = vld [vmem:[%s380_s2] sm:$0xf]  ;;  %vm89_vm1 = vcmask 7168   ;;  %v304_v20 = vmov 0.0   ;;  %v72_v22 = vand.u32 127, %v71_v21 }
  0x16   :  { %v39_v6 = vsel %vm37_vm0, %v33_v3, 0.0  ;;  %v44_v8 = vsel %vm37_vm0, %v34_v5, 0.0  ;;  %231 = vmatprep.subr.mxu0 %v304_v20  ;;  %v74_v23 = vshrl.u32 %v71_v21, 7  ;;  %vm81_vm2 = vcmask 1041409   ;;  %s307_s2 = smov [#allocation5]  }
  0x17   :  { %v40_v9 = vadd.f32 %v39_v6, %v38_v4  ;;  %v45_v10 = vadd.f32 %v44_v8, %v43_v7  ;;  %232 = vmatpush3.xpose.msk.msra.mxu0 %vm89_vm1, %v51_v19  ;;  %vm84_vm3 = vcmask 25600   ;;  %vm305_vm4 = vmmov 0   ;;  %s213_s28 = sshll.u32 %s307_s2, 4  ;;  %s214_s28 = int_to_ptr.vmem [resolvable:$true] %s213_s28 }
  0x18   :  { %v75_v24 = vsub.s32 %v72_v22, %v74_v23  ;;  %233 = vmatprep.mubr.msk.f32.mxu0 %vm305_vm4, %v304_v20  ;;  %v181_v38 = vsub.s32 1, %v74_v23  ;;  %v174_v39 = vsub.s32 0, %v74_v23  ;;  %v306_v43 = vmov 839922192   ;;  %s274_s29 = scalar_lea.vmem %s214_s28, 256  ;;  %p279_p9 = scmp.lt.s32.totalorder %s214_s28, %s214_s28 }
  0x19   :  { %41 = vadd.xlane.f32.xlu0 %v40_v9  ;;  %v189_v44 = vunpack.c.l.s4 %v306_v43  ;;  %p275_p8 = scmp.ne.s32.totalorder %s214_s28, %s274_s29  ;;  %p280_p10 = scmp.lt.s32.totalorder %s274_s29, %s274_s29 }
  0x1b   :  { %v190_v45 = vunpack.c.0.s8 %v189_v44  ;;  %p281_p11 = por %p280_p10, %p279_p9 }
  0x1d   :  { %46 = vadd.xlane.f32.xlu0 %v45_v10  ;;  %v193_v46 = vsub.s32 %v190_v45, %v74_v23  ;;  %p282_p12 = pnand %p281_p11, %p275_p8 }
  0x87   :  { %v59_v13 = vpop.permute.xlu1 %58 }
  0xa6   :  { %v42_v12 = vpop.xlane.xlu0 %41 }
  0xa7   :  { %v48_v14 = vmul.f32 0.00390625, %v42_v12 }
  0xa9   :  { %v61_v15 = vmul.f32 %v59_v13, %v48_v14 }
  0xaa   :  { %v47_v16 = vpop.xlane.xlu0 %46 }
  0xab   :  { %v49_v17 = vmul.f32 0.00390625, %v47_v16  ;;  %66 = vperm.xlu1 %244, %v61_v15  }
  0xad   :  { %v62_v18 = vmul.f32 %v59_v13, %v49_v17 }
  0xaf   :  { %69 = vperm.xlu0 %245, %v62_v18  }
 0x12a   :  { %v67_v25 = vpop.permute.xlu1 %66 }
 0x12b   :  { %v76_v27 = vrot.slane %v67_v25, %v75_v24 }
 0x12e   :  { %v70_v26 = vpop.permute.xlu0 %69 }
 0x12f   :  { %v80_v28 = vrot.slane %v70_v26, %v75_v24 }
 0x131   :  { %v82_v29 = vsel %vm81_vm2, %v80_v28, %v76_v27 }
 0x132   :  { %v85_v30 = vsel %vm84_vm3, %v82_v29, 0.0 }
 0x133   :  { %86 = vadd.xlane.f32.xlu1 %v85_v30 }
 0x1c0   :  { %v87_v31 = vpop.xlane.xlu1 %86 }
 0x1c1   :  { %v88_v32 = vmax.f32 %v87_v31, 0.0 }
 0x1c3   :  { %234 = vmatmul.mubr.msk.f32.vlgmr.msra.gmra.mrb[0].mxu0 %vm89_vm1, %v88_v32 }
 0x296   :  { %v162_v33 = vpop.f32.mrb[0].mxu0 }
 0x297   :  { %v228_v34 = vmul.f32 -1.442695, %v162_v33  ;;  %v235_v35 = vpop.f32.mrb[1].mxu0 }
 0x299   :  { %248 = vpow2.f32 %v228_v34 }
 0x2a3   :  { %v249_v36 = vpop.eup %248 }
 0x2a4   :  { %v169_v37 = vadd.f32 1.0, %v249_v36 }
 0x2a6   :  { %250 = vrcp.f32 %v169_v37 }
 0x2b0   :  { %v251_v40 = vpop.eup %250 }
 0x2b1   :  { %v182_v41 = vrot.slane %v251_v40, %v181_v38  ;;  %v175_v42 = vrot.slane %v251_v40, %v174_v39 }
 0x2b3   :  { %184 = vbcast.lane.b32.xlu0 %v182_v41, 256  ;;  %177 = vbcast.lane.b32.xlu1 %v175_v42, 256 }
 0x325   :  { %v185_v47 = vpop.permute.xlu0 %184  ;;  %v178_v48 = vpop.permute.xlu1 %177 }
 0x326   :  { %v201_v49 = vrot.slane %v185_v47, %v193_v46  ;;  %v194_v50 = vrot.slane %v178_v48, %v193_v46 }
 0x328   :  { %v205_v51 = vmul.f32 %v201_v49, %v345_v1  ;;  %v204_v52 = vmul.f32 %v194_v50, %v343_v0 }
 0x32a   :  { %207 = vst [vmem:[#allocation5 + $0x8] sm:$0xff] %v205_v51  ;;  %206 = vst [vmem:[#allocation5] sm:$0xff] %v204_v52 }
 0x32b   :  { %285 = shalt.err (!%p282_p12)
}
 0x32c   :  { %s286_s5 = scalar_lea.hbm %s381_s3, 256 }
 0x32d   :  { %p287_p13 = scmp.ne.s32.totalorder %s381_s3, %s286_s5  ;;  %p290_p0 = scmp.lt.u32.totalorder %s286_s5, %s381_s3 }
 0x32f   :  { %p292_p1 = pnand %p290_p0, %p287_p13 }
 0x331   :  { %295 = shalt.err (!%p292_p1)
}
 0x332   :  { %219 = dma.vmem_to_hbm [thread:$0]  %s214_s28, 256, %s381_s3, [#allocation4], %s301_s22, %s301_s22, %s302_s23  }
 0x333   :  { %298 = dma.done.wait [#allocation4], 256  }
 0x334   :  { %299 = vsyncadd [#allocation4], 4294967040 }
 0x335   :  { %223 = vsyncpa [#allocation3], 1 }
 0x336   :  { %224 = vsyncpa [#allocation4], 1 }

</bundles_post_ra>
